<compile_context>
chip_gen: v7x
topology: tpu7x:2x2x1
jax: 0.10.0
libtpu: 0.0.40
codegen_flags: <defaults>
</compile_context>

<pallas_src>
import functools
import math

import jax
import jax.numpy as jnp
from jax import lax
from jax.experimental import pallas as pl
from jax.experimental.pallas import tpu as pltpu


# ---------------------------------------------------------------------------
# Kernel: one grid step handles a block of anchor rows against the full
# contrast set, producing the per-anchor loss for those rows.
# ---------------------------------------------------------------------------
def _supcon_kernel(feats_ref, mask_ref, out_ref, *,
                   temperature, base_temperature, method, block_rows, n_total):
    row_base = pl.program_id(0) * block_rows
    if block_rows % 128 == 0:
        row_base = pl.multiple_of(row_base, 128)

    fc = feats_ref[...]                                  # (N,  Dp) full contrast set (resident)
    fa = feats_ref[pl.ds(row_base, block_rows), :]       # (TM, Dp) anchor block (slice, no extra DMA)
    mask = mask_ref[...]                                 # (TM, N)  tiled label-similarity mask rows

    # anchor_dot_contrast / temperature  (MXU, f32 accumulate; contract last dims)
    logits = lax.dot_general(
        fa, fc, (((1,), (1,)), ((), ())),
        preferred_element_type=jnp.float32) * (1.0 / temperature)

    # subtract row-wise max (detach is a no-op in forward)
    logits = logits - jnp.max(logits, axis=1, keepdims=True)
    alignment = logits

    # inv_diagonal: zero out self-contrast pairs (global diagonal)
    rows = lax.broadcasted_iota(jnp.int32, (block_rows, n_total), 0) + row_base
    cols = lax.broadcasted_iota(jnp.int32, (block_rows, n_total), 1)
    inv_diag = (rows != cols).astype(jnp.float32)

    if method == "expw":
        uniformity = jnp.exp(logits * (1.0 - mask)) * inv_diag
    elif method == "supcon":
        uniformity = jnp.exp(logits) * inv_diag
    else:
        # TODO(synk): method == 'threshold' needs the full NxN mask and a rank
        # count over a 3-D delta tensor; not implemented in-kernel.
        raise NotImplementedError(f"method={method!r} not supported in-kernel")

    log_uniformity = jnp.log(jnp.sum(uniformity, axis=1, keepdims=True))  # (TM, 1)

    positive_mask = mask * inv_diag
    log_prob = alignment - log_uniformity                                  # (TM, N)
    num = jnp.sum(positive_mask * log_prob, axis=1, keepdims=True)         # (TM, 1)
    den = jnp.sum(positive_mask, axis=1, keepdims=True)                    # (TM, 1)
    per_anchor = (-(temperature / base_temperature)) * (num / den)         # (TM, 1)

    out_ref[...] = per_anchor.astype(out_ref.dtype)


# ---------------------------------------------------------------------------
# Wrapper: mirrors KernelizedSupCon.forward (contrast_mode='all').
# ---------------------------------------------------------------------------
def kernelized_supcon_loss(features, labels=None, *,
                           method="supcon", temperature=0.07,
                           contrast_mode="all", base_temperature=0.07,
                           krnl_sigma=1.0, kernel=None, block_rows=None):
    if features.ndim != 3:
        raise ValueError("`features` needs to be [bsz, n_views, n_feats]")
    if kernel is not None and method == "supcon":
        raise ValueError("Kernel must be none if method=supcon")
    if kernel is None and method != "supcon":
        raise ValueError("Kernel must not be none if method != supcon")
    if contrast_mode != "all":
        raise NotImplementedError("only contrast_mode='all' is implemented")

    bsz, n_views, d = features.shape
    n_total = bsz * n_views

    # --- base similarity mask [bsz, bsz] (self.kernel is an arbitrary Python
    #     callable in the module, so it is evaluated here, in the same jit) ---
    if labels is None:
        base_mask = jnp.eye(bsz, dtype=jnp.float32)
    else:
        lab = labels.reshape(-1, 1)
        if lab.shape[0] != bsz:
            raise ValueError("Num of labels does not match num of features")
        if kernel is None:
            base_mask = (lab == lab.T).astype(jnp.float32)
        else:
            base_mask = kernel(lab, krnl_sigma=krnl_sigma).astype(jnp.float32)

    # torch.cat(torch.unbind(features, dim=1), dim=0)  ==  transpose + reshape
    feats = jnp.transpose(features, (1, 0, 2)).reshape(n_total, d).astype(jnp.float32)
    # mask.repeat(anchor_count, view_count)  ==  jnp.tile
    mask = jnp.tile(base_mask, (n_views, n_views))

    # Lane-align the contraction dim (zero cols do not change f @ f^T).
    d_pad = ((d + 127) // 128) * 128
    if d_pad != d:
        feats = jnp.pad(feats, ((0, 0), (0, d_pad - d)))

    # Anchor-row tiling: a block must be a multiple of 128 rows or cover all rows.
    if block_rows is None:
        block_rows = n_total if n_total <= 512 else 512
    if n_total % block_rows != 0 or (block_rows != n_total and block_rows % 128 != 0):
        block_rows = n_total
    grid = (n_total // block_rows,)

    kern = functools.partial(
        _supcon_kernel,
        temperature=float(temperature),
        base_temperature=float(base_temperature),
        method=method,
        block_rows=block_rows,
        n_total=n_total,
    )

    per_anchor = pl.pallas_call(
        kern,
        out_shape=jax.ShapeDtypeStruct((n_total, 1), jnp.float32),
        grid_spec=pltpu.PrefetchScalarGridSpec(
            num_scalar_prefetch=0,
            grid=grid,
            in_specs=[
                # full feature matrix, VMEM-resident across the whole grid
                pl.BlockSpec((n_total, d_pad), lambda i: (0, 0)),
                # rows of the tiled mask for this anchor block
                pl.BlockSpec((block_rows, n_total), lambda i: (i, 0)),
            ],
            out_specs=pl.BlockSpec((block_rows, 1), lambda i: (i, 0)),
        ),
        compiler_params=pltpu.CompilerParams(
            dimension_semantics=("parallel",)),   # independent row blocks
    )(feats, mask)

    # loss.mean() -- tiny reduction fused by XLA in the same jit.
    return jnp.mean(per_anchor)


# ---------------------------------------------------------------------------
# Pure-JAX reference (direct transcription of the PyTorch forward) for checking.
# ---------------------------------------------------------------------------
def _reference_loss(features, labels, *, method, temperature, base_temperature,
                    krnl_sigma, kernel):
    bsz, n_views, d = features.shape
    if labels is None:
        mask = jnp.eye(bsz, dtype=jnp.float32)
    else:
        lab = labels.reshape(-1, 1)
        mask = ((lab == lab.T).astype(jnp.float32) if kernel is None
                else kernel(lab, krnl_sigma=krnl_sigma).astype(jnp.float32))
    n = bsz * n_views
    feats = jnp.transpose(features, (1, 0, 2)).reshape(n, d).astype(jnp.float32)
    mask = jnp.tile(mask, (n_views, n_views))
    inv_diag = 1.0 - jnp.eye(n, dtype=jnp.float32)
    adc = jnp.dot(feats, feats.T, precision=lax.Precision.HIGHEST) / temperature
    logits = adc - jnp.max(adc, axis=1, keepdims=True)
    alignment = logits
    if method == "expw":
        uniformity = jnp.exp(logits * (1.0 - mask)) * inv_diag
    else:
        uniformity = jnp.exp(logits) * inv_diag
    uniformity = jnp.log(jnp.sum(uniformity, axis=1, keepdims=True))
    pm = mask * inv_diag
    log_prob = alignment - uniformity
    log_prob = jnp.sum(pm * log_prob, axis=1) / jnp.sum(pm, axis=1)
    return jnp.mean(-(temperature / base_temperature) * log_prob)


if __name__ == "__main__":
    bsz, n_views, d = 8, 2, 32
    key = jax.random.PRNGKey(0)
    kf, kl = jax.random.split(key)

    raw = jax.random.normal(kf, (bsz, n_views, d), jnp.float32)
    # contrastive losses consume L2-normalized embeddings
    features = raw / jnp.linalg.norm(raw, axis=-1, keepdims=True)
    labels = jnp.array([0, 1, 0, 1, 2, 2, 3, 3], jnp.int32)

    # --- method='supcon' (kernel=None, discrete labels) ---
    supcon_fn = jax.jit(functools.partial(
        kernelized_supcon_loss, method="supcon",
        temperature=0.07, base_temperature=0.07))
    loss = supcon_fn(features, labels)
    jax.block_until_ready(loss)
    ref = _reference_loss(features, labels, method="supcon", temperature=0.07,
                          base_temperature=0.07, krnl_sigma=1.0, kernel=None)
    assert bool(jnp.isfinite(loss))
    assert bool(jnp.allclose(loss, ref, rtol=1e-3, atol=1e-3)), (loss, ref)

    # --- method='expw' with an RBF kernel on continuous labels ---
    def rbf_kernel(lab, krnl_sigma):
        lab = lab.astype(jnp.float32)
        diff = lab - lab.T
        return (jnp.exp(-diff * diff / (2.0 * krnl_sigma * krnl_sigma))
                / (math.sqrt(2.0 * math.pi) * krnl_sigma))

    cont_labels = jax.random.normal(kl, (bsz,), jnp.float32)
    expw_fn = jax.jit(functools.partial(
        kernelized_supcon_loss, method="expw", kernel=rbf_kernel,
        krnl_sigma=1.0, temperature=0.07, base_temperature=0.07))
    loss2 = expw_fn(features, cont_labels)
    jax.block_until_ready(loss2)
    ref2 = _reference_loss(features, cont_labels, method="expw", temperature=0.07,
                           base_temperature=0.07, krnl_sigma=1.0, kernel=rbf_kernel)
    assert bool(jnp.isfinite(loss2))
    assert bool(jnp.allclose(loss2, ref2, rtol=1e-3, atol=1e-3)), (loss2, ref2)

    # --- labels=None degenerates to SimCLR-style eye mask ---
    simclr_fn = jax.jit(functools.partial(
        kernelized_supcon_loss, method="supcon",
        temperature=0.07, base_temperature=0.07))
    loss3 = simclr_fn(features, None)
    jax.block_until_ready(loss3)
    ref3 = _reference_loss(features, None, method="supcon", temperature=0.07,
                           base_temperature=0.07, krnl_sigma=1.0, kernel=None)
    assert bool(jnp.isfinite(loss3))
    assert bool(jnp.allclose(loss3, ref3, rtol=1e-3, atol=1e-3)), (loss3, ref3)

    print("KERNEL_OK")
</pallas_src>

<mosaic_0001>
module attributes {stable_mosaic.version = 11 : i64} {
  func.func @_supcon_kernel(%arg0: i32, %arg1: memref<16x128xf32, #tpu.memory_space<vmem>>, %arg2: memref<16x16xf32, #tpu.memory_space<vmem>>, %arg3: memref<16x1xf32, #tpu.memory_space<vmem>>) attributes {dimension_semantics = [#tpu.dimension_semantics<parallel>], iteration_bounds = array<i64: 1>, scalar_prefetch = 0 : i64, scratch_operands = 0 : i64, tpu.core_type = #tpu.core_type<tc>, window_params = [{pipeline_mode = #tpu.pipeline_mode<synchronous>, transform_indices = @transform_0, window_bounds = array<i64: 16, 128>}, {transform_indices = @transform_1, window_bounds = array<i64: 16, 16>}, {transform_indices = @transform_2, window_bounds = array<i64: 16, 1>}]} {
    %c16_i32 = arith.constant 16 : i32
    %0 = arith.muli %arg0, %c16_i32 : i32
    %c0 = arith.constant 0 : index
    %c0_0 = arith.constant 0 : index
    %1 = vector.load %arg1[%c0, %c0_0] : memref<16x128xf32, #tpu.memory_space<vmem>>, vector<16x128xf32>
    %2 = arith.index_cast %0 : i32 to index
    %c0_1 = arith.constant 0 : index
    %3 = vector.load %arg1[%2, %c0_1] : memref<16x128xf32, #tpu.memory_space<vmem>>, vector<16x128xf32>
    %c0_2 = arith.constant 0 : index
    %c0_3 = arith.constant 0 : index
    %4 = vector.load %arg2[%c0_2, %c0_3] : memref<16x16xf32, #tpu.memory_space<vmem>>, vector<16x16xf32>
    %cst = arith.constant dense<0.000000e+00> : vector<16x16xf32>
    %5 = tpu.matmul %3, %1, %cst {dimension_numbers = #tpu.dot_dimension_numbers<[1], [1], [0], [0], [0, 0, 1, 0], [], []>} : vector<16x128xf32>, vector<16x128xf32>, vector<16x16xf32> -> vector<16x16xf32>
    %cst_4 = arith.constant 14.2857141 : f32
    %6 = vector.broadcast %cst_4 : f32 to vector<16x16xf32>
    %7 = arith.mulf %5, %6 : vector<16x16xf32>
    %cst_5 = arith.constant dense<0xFF800000> : vector<16xf32>
    %8 = vector.multi_reduction <maximumf>, %7, %cst_5 [1] : vector<16x16xf32> to vector<16xf32>
    %9 = vector.shape_cast %8 : vector<16xf32> to vector<16x1xf32>
    %10 = vector.broadcast %9 : vector<16x1xf32> to vector<16x16xf32>
    %11 = arith.subf %7, %10 : vector<16x16xf32>
    %12 = tpu.iota {dimensions = array<i32: 0>} : vector<16x16xi32>
    %13 = vector.broadcast %0 : i32 to vector<16x16xi32>
    %14 = arith.addi %12, %13 : vector<16x16xi32>
    %15 = tpu.iota {dimensions = array<i32: 1>} : vector<16x16xi32>
    %16 = arith.cmpi ne, %14, %15 : vector<16x16xi32>
    %17 = arith.extui %16 : vector<16x16xi1> to vector<16x16xi32>
    %18 = arith.sitofp %17 : vector<16x16xi32> to vector<16x16xf32>
    %19 = math.exp %11 : vector<16x16xf32>
    %20 = arith.mulf %19, %18 : vector<16x16xf32>
    %cst_6 = arith.constant dense<0.000000e+00> : vector<16xf32>
    %21 = vector.multi_reduction <add>, %20, %cst_6 [1] : vector<16x16xf32> to vector<16xf32>
    %22 = vector.shape_cast %21 : vector<16xf32> to vector<16x1xf32>
    %23 = math.log %22 : vector<16x1xf32>
    %24 = arith.mulf %4, %18 : vector<16x16xf32>
    %25 = vector.broadcast %23 : vector<16x1xf32> to vector<16x16xf32>
    %26 = arith.subf %11, %25 : vector<16x16xf32>
    %27 = arith.mulf %24, %26 : vector<16x16xf32>
    %cst_7 = arith.constant dense<0.000000e+00> : vector<16xf32>
    %28 = vector.multi_reduction <add>, %27, %cst_7 [1] : vector<16x16xf32> to vector<16xf32>
    %29 = vector.shape_cast %28 : vector<16xf32> to vector<16x1xf32>
    %cst_8 = arith.constant dense<0.000000e+00> : vector<16xf32>
    %30 = vector.multi_reduction <add>, %24, %cst_8 [1] : vector<16x16xf32> to vector<16xf32>
    %31 = vector.shape_cast %30 : vector<16xf32> to vector<16x1xf32>
    %32 = arith.divf %29, %31 : vector<16x1xf32>
    %cst_9 = arith.constant -1.000000e+00 : f32
    %33 = vector.broadcast %cst_9 : f32 to vector<16x1xf32>
    %34 = arith.mulf %33, %32 : vector<16x1xf32>
    %c0_10 = arith.constant 0 : index
    %c0_11 = arith.constant 0 : index
    %35 = vector.load %arg3[%c0_10, %c0_11] : memref<16x1xf32, #tpu.memory_space<vmem>>, vector<16x1xf32>
    tpu.vector_store %arg3[%c0_10, %c0_11], %34 {strides = array<i32>} : memref<16x1xf32, #tpu.memory_space<vmem>>, vector<16x1xf32>,
    return
  }
  func.func @transform_0(%arg0: i32) -> (i32, i32) {
    %c0_i32 = arith.constant 0 : i32
    %c0_i32_0 = arith.constant 0 : i32
    %c0_i32_1 = arith.constant 0 : i32
    return %c0_i32, %c0_i32_0 : i32, i32
  }
  func.func @transform_1(%arg0: i32) -> (i32, i32) {
    %c0_i32 = arith.constant 0 : i32
    %c0_i32_0 = arith.constant 0 : i32
    return %arg0, %c0_i32 : i32, i32
  }
  func.func @transform_2(%arg0: i32) -> (i32, i32) {
    %c0_i32 = arith.constant 0 : i32
    %c0_i32_0 = arith.constant 0 : i32
    return %arg0, %c0_i32 : i32, i32
  }
}

</mosaic_0001>

<bundles_post_ra>
// kernel: tile.8
= control target key start
LH: loop header
LB: loop body
LE: loop exit
PB: predicated region body
PF: predicated region fallthrough
CT: control target
= control target key end

     0   :  { %s154_s0 = inlined_call_operand.vmem [shape: f32[8,8], index: 0, kind: input, shape index: {}]   ;;  %s155_s1 = inlined_call_operand.vmem [shape: f32[2,8,2,8], index: 1, kind: output, shape index: {}]  }
   0x1   :  { %v4_v0 = vld [vmem:[%s154_s0] ss:$0 sm:$0xff]  ;;  %v51_v1 = vld [vmem:[%s154_s0 + $0x1] ss:$0 sm:$0xff]  ;;  %v54_v2 = vld [vmem:[%s154_s0 + $0x2] ss:$0 sm:$0xff] }
   0x2   :  { %5 = vst [vmem:[%s155_s1] sm:$0x3] %v4_v0  ;;  %50 = vst [vmem:[%s155_s1 + $0x10] sm:$0x3] %v4_v0  ;;  %v57_v3 = vld [vmem:[%s154_s0 + $0x3] ss:$0 sm:$0xff] }
   0x3   :  { %52 = vst [vmem:[%s155_s1 + $0x2] sm:$0x3] %v51_v1  ;;  %53 = vst [vmem:[%s155_s1 + $0x12] sm:$0x3] %v51_v1  ;;  %v60_v4 = vld [vmem:[%s154_s0 + $0x4] ss:$0 sm:$0xff] }
   0x4   :  { %55 = vst [vmem:[%s155_s1 + $0x4] sm:$0x3] %v54_v2  ;;  %56 = vst [vmem:[%s155_s1 + $0x14] sm:$0x3] %v54_v2  ;;  %v63_v5 = vld [vmem:[%s154_s0 + $0x5] ss:$0 sm:$0xff] }
   0x5   :  { %58 = vst [vmem:[%s155_s1 + $0x6] sm:$0x3] %v57_v3  ;;  %59 = vst [vmem:[%s155_s1 + $0x16] sm:$0x3] %v57_v3  ;;  %v66_v6 = vld [vmem:[%s154_s0 + $0x6] ss:$0 sm:$0xff] }
   0x6   :  { %61 = vst [vmem:[%s155_s1 + $0x8] sm:$0x3] %v60_v4  ;;  %62 = vst [vmem:[%s155_s1 + $0x18] sm:$0x3] %v60_v4  ;;  %v69_v7 = vld [vmem:[%s154_s0 + $0x7] ss:$0 sm:$0xff] }
   0x7   :  { %64 = vst [vmem:[%s155_s1 + $0xa] sm:$0x3] %v63_v5  ;;  %65 = vst [vmem:[%s155_s1 + $0x1a] sm:$0x3] %v63_v5 }
   0x8   :  { %67 = vst [vmem:[%s155_s1 + $0xc] sm:$0x3] %v66_v6  ;;  %68 = vst [vmem:[%s155_s1 + $0x1c] sm:$0x3] %v66_v6 }
   0x9   :  { %70 = vst [vmem:[%s155_s1 + $0xe] sm:$0x3] %v69_v7  ;;  %71 = vst [vmem:[%s155_s1 + $0x1e] sm:$0x3] %v69_v7 }

// kernel: tile.9
= control target key start
LH: loop header
LB: loop body
LE: loop exit
PB: predicated region body
PF: predicated region fallthrough
CT: control target
= control target key end

     0   :  { %vm82_vm0 = vcmask 1047556   ;;  %vm84_vm1 = vcmask 64512   ;;  %vm103_vm2 = vcmask 130112   ;;  %s225_s0 = inlined_call_operand.vmem [shape: f32[2,8,2,8], index: 0, kind: input, shape index: {}]   ;;  %s226_s1 = inlined_call_operand.vmem [shape: f32[16,16], index: 1, kind: output, shape index: {}]  }
   0x1   :  { %v138_v0 = vld [vmem:[%s225_s0 + $0xe] sm:$0x3]  ;;  %v139_v1 = vld [vmem:[%s225_s0 + $0xc] sm:$0x3]  ;;  %v140_v2 = vld [vmem:[%s225_s0 + $0xa] sm:$0x3] }
   0x2   :  { %48 = vst [vmem:[#allocation0 + $0x38] sm:$0x3] %v138_v0  ;;  %53 = vst [vmem:[#allocation0 + $0x30] sm:$0x3] %v139_v1  ;;  %v141_v3 = vld [vmem:[%s225_s0 + $0x8] sm:$0x3] }
   0x3   :  { %58 = vst [vmem:[#allocation0 + $0x28] sm:$0x3] %v140_v2  ;;  %v142_v4 = vld [vmem:[%s225_s0 + $0x6] sm:$0x3]  ;;  %v143_v5 = vld [vmem:[%s225_s0 + $0x4] sm:$0x3] }
   0x4   :  { %63 = vst [vmem:[#allocation0 + $0x20] sm:$0x3] %v141_v3  ;;  %68 = vst [vmem:[#allocation0 + $0x18] sm:$0x3] %v142_v4  ;;  %v144_v6 = vld [vmem:[%s225_s0 + $0x2] sm:$0x3] }
   0x5   :  { %73 = vst [vmem:[#allocation0 + $0x10] sm:$0x3] %v143_v5  ;;  %v78_v7 = vld [vmem:[%s225_s0] sm:$0x3]  ;;  %77 = vst [vmem:[#allocation0 + $0x8] sm:$0x3] %v144_v6 }
   0x6   :  { %79 = vst [vmem:[#allocation0] sm:$0x3] %v78_v7  ;;  %v130_v8 = vld [vmem:[%s225_s0 + $0x1e] sm:$0x3]  ;;  %v131_v9 = vld [vmem:[%s225_s0 + $0x1c] sm:$0x3] }
   0x7   :  { %v132_v10 = vld [vmem:[%s225_s0 + $0x1a] sm:$0x3]  ;;  %8 = vst [vmem:[#allocation0 + $0x78] sm:$0x3] %v130_v8  ;;  %13 = vst [vmem:[#allocation0 + $0x70] sm:$0x3] %v131_v9 }
   0x8   :  { %18 = vst [vmem:[#allocation0 + $0x68] sm:$0x3] %v132_v10  ;;  %v133_v11 = vld [vmem:[%s225_s0 + $0x18] sm:$0x3]  ;;  %v134_v12 = vld [vmem:[%s225_s0 + $0x16] sm:$0x3] }
   0x9   :  { %v135_v13 = vld [vmem:[%s225_s0 + $0x14] sm:$0x3]  ;;  %23 = vst [vmem:[#allocation0 + $0x60] sm:$0x3] %v133_v11  ;;  %28 = vst [vmem:[#allocation0 + $0x58] sm:$0x3] %v134_v12 }
   0xa   :  { %33 = vst [vmem:[#allocation0 + $0x50] sm:$0x3] %v135_v13  ;;  %v136_v14 = vld [vmem:[%s225_s0 + $0x12] sm:$0x3]  ;;  %v137_v15 = vld [vmem:[%s225_s0 + $0x10] sm:$0x3] }
   0xb   :  { %38 = vst [vmem:[#allocation0 + $0x48] sm:$0x3] %v136_v14  ;;  %43 = vst [vmem:[#allocation0 + $0x40] sm:$0x3] %v137_v15  ;;  %s148_s0 = smov 8  }
   0xc   :  { %v98_v16 = vld [vmem:[#allocation0 + $0x1] ss:$8 sm:$0xf0]   ;;  %v81_v17 = vld [vmem:[#allocation0] ss:$8 sm:$0xf0]  }
   0xd   :  { %v96_v18 = vld [vmem:[#allocation0 + $0x1] ss:$8 sm:$0xf]   ;;  %v80_v19 = vld [vmem:[#allocation0] ss:$8 sm:$0xf]  }
   0xe   :  { %v100_v20 = vsel %vm82_vm0, %v98_v16, %v96_v18  ;;  %v83_v21 = vsel %vm82_vm0, %v81_v17, %v80_v19 }
   0xf   :  { %101 = vrot.lane.b32.xlu0 %v100_v20, %s148_s0  ;;  %85 = vst.msk [vmem:[%s226_s1] sm:$0xff] %vm84_vm1, %v83_v21  }
  0x10   :  { %v108_v22 = vld [vmem:[#allocation0 + $0x41] ss:$8 sm:$0xf0]   ;;  %v89_v23 = vld [vmem:[#allocation0 + $0x40] ss:$8 sm:$0xf0]  }
  0x12   :  { %v106_v24 = vld [vmem:[#allocation0 + $0x41] ss:$8 sm:$0xf]   ;;  %v87_v25 = vld [vmem:[#allocation0 + $0x40] ss:$8 sm:$0xf]  }
  0x13   :  { %v110_v26 = vsel %vm82_vm0, %v108_v22, %v106_v24  ;;  %v91_v27 = vsel %vm82_vm0, %v89_v23, %v87_v25 }
  0x14   :  { %145 = vst.msk [vmem:[%s226_s1 + $0x8] sm:$0xff] %vm84_vm1, %v91_v27   ;;  %111 = vrot.lane.b32.xlu0 %v110_v26, %s148_s0 }
  0x81   :  { %v102_v28 = vpop.permute.xlu0 %101  }
  0x82   :  { %104 = vst.msk [vmem:[%s226_s1] sm:$0xff] %vm103_vm2, %v102_v28  }
  0x86   :  { %v112_v29 = vpop.permute.xlu0 %111  }
  0x87   :  { %146 = vst.msk [vmem:[%s226_s1 + $0x8] sm:$0xff] %vm103_vm2, %v112_v29  }

// kernel: kernelized_supcon_loss.1
= control target key start
LH: loop header
LB: loop body
LE: loop exit
PB: predicated region body
PF: predicated region fallthrough
CT: control target
= control target key end

     0   :  { %vm96_vm0 = vcmask 130048   ;;  %v105_v11 = vlaneseq  ;;  %v196_v19 = vmov 0.0   ;;  %vm159_vm3 = vcmask 7168   ;;  %s238_s0 = inlined_call_operand.vmem [shape: f32[16,128], index: 0, kind: input, shape index: {}]   ;;  %s239_s1 = inlined_call_operand.vmem [shape: f32[16,16], index: 1, kind: input, shape index: {}]   ;;  %s240_s2 = inlined_call_operand.vmem [shape: f32[16,1], index: 2, kind: output, shape index: {}]  }
   0x1   :  { %v12_v0 = vld [vmem:[%s238_s0] sm:$0xff]  ;;  %v13_v1 = vld [vmem:[%s238_s0 + $0x8] sm:$0xff] }
   0x2   :  { %v179_v2 = vpack.c.bf16 %v13_v1, %v12_v0  ;;  %176 = vmatprep.mubr.f32.mxu0 %v12_v0  ;;  %v106_v15 = vshrl.u32 %v105_v11, 7  ;;  %v112_v16 = vand.u32 127, %v105_v11  ;;  %v17_v28 = vld [vmem:[%s239_s1] sm:$0xff]  ;;  %v18_v31 = vld [vmem:[%s239_s1 + $0x8] sm:$0xff] }
   0x4   :  { %180 = vmatprep.subr.bf16.mxu0 %v179_v2  ;;  %vm113_vm1 = vcmp.ne.s32.totalorder %v106_v15, %v112_v16  ;;  %v107_v18 = vadd.s32 8, %v106_v15 }
   0x5   :  { %182 = vmatpush3.bf16.xpose.msra.mxu0 %v179_v2  ;;  %v166_v20 = vsel %vm113_vm1, 1.0, %v196_v19 }
   0x6   :  { %vm114_vm2 = vcmp.ne.s32.totalorder %v107_v18, %v112_v16  ;;  %v135_v29 = vmul.f32 %v166_v20, %v17_v28 }
   0x7   :  { %v167_v23 = vsel %vm114_vm2, 1.0, %v196_v19 }
   0x8   :  { %v147_v30 = vsel %vm96_vm0, %v135_v29, 0.0  ;;  %v136_v32 = vmul.f32 %v167_v23, %v18_v31 }
   0xa   :  { %v150_v33 = vsel %vm96_vm0, %v136_v32, 0.0 }
   0xc   :  { %177 = vmatmul.mubr.f32.vlgmr.msra.gmra.mrb[0].mxu0 %v13_v1 }
  0xdf   :  { %v178_v3 = vpop.f32.mrb[0].mxu0 }
  0xe0   :  { %v85_v4 = vpop.f32.mrb[1].mxu0  ;;  %v95_v6 = vmul.f32 14.285714, %v178_v3 }
  0xe1   :  { %v94_v5 = vmul.f32 14.285714, %v85_v4 }
  0xe2   :  { %v100_v8 = vsel %vm96_vm0, %v95_v6, -inf }
  0xe3   :  { %v97_v7 = vsel %vm96_vm0, %v94_v5, -inf }
  0xe4   :  { %98 = vmax.xlane.f32.xlu0 %v97_v7 }
  0xe8   :  { %101 = vmax.xlane.f32.xlu0 %v100_v8 }
  0xec   :  { %148 = vadd.xlane.f32.xlu0 %v147_v30 }
 0x171   :  { %v99_v9 = vpop.xlane.xlu0 %98 }
 0x172   :  { %v103_v10 = vsub.f32 %v94_v5, %v99_v9 }
 0x174   :  { %v119_v12 = vmul.f32 1.442695, %v103_v10 }
 0x175   :  { %v102_v13 = vpop.xlane.xlu0 %101 }
 0x176   :  { %184 = vpow2.f32 %v119_v12  ;;  %v104_v14 = vsub.f32 %v95_v6, %v102_v13 }
 0x178   :  { %v121_v17 = vmul.f32 1.442695, %v104_v14 }
 0x179   :  { %v149_v46 = vpop.xlane.xlu0 %148 }
 0x17a   :  { %186 = vpow2.f32 %v121_v17 }
 0x180   :  { %v185_v21 = vpop.eup %184 }
 0x181   :  { %v123_v22 = vmul.f32 %v185_v21, %v166_v20 }
 0x183   :  { %v125_v24 = vsel %vm96_vm0, %v123_v22, 0.0 }
 0x184   :  { %v187_v25 = vpop.eup %186  ;;  %126 = vadd.xlane.f32.xlu1 %v125_v24 }
 0x185   :  { %v124_v26 = vmul.f32 %v187_v25, %v167_v23 }
 0x187   :  { %v128_v27 = vsel %vm96_vm0, %v124_v26, 0.0 }
 0x188   :  { %129 = vadd.xlane.f32.xlu1 %v128_v27 }
 0x18c   :  { %151 = vadd.xlane.f32.xlu1 %v150_v33 }
 0x211   :  { %v127_v34 = vpop.xlane.xlu1 %126 }
 0x212   :  { %188 = vlog2.f32 %v127_v34 }
 0x215   :  { %v130_v35 = vpop.xlane.xlu1 %129 }
 0x216   :  { %190 = vlog2.f32 %v130_v35 }
 0x217   :  { %192 = vrcp.f32 %v149_v46 }
 0x219   :  { %v152_v47 = vpop.xlane.xlu1 %151 }
 0x21a   :  { %194 = vrcp.f32 %v152_v47 }
 0x21c   :  { %v189_v36 = vpop.eup %188 }
 0x21d   :  { %v132_v37 = vmul.f32 0.6931472, %v189_v36 }
 0x21f   :  { %v137_v38 = vsub.f32 %v103_v10, %v132_v37 }
 0x220   :  { %v191_v39 = vpop.eup %190 }
 0x221   :  { %v134_v40 = vmul.f32 0.6931472, %v191_v39  ;;  %v139_v41 = vmul.f32 %v137_v38, %v135_v29  ;;  %v193_v48 = vpop.eup %192 }
 0x223   :  { %v141_v42 = vsel %vm96_vm0, %v139_v41, 0.0  ;;  %v138_v43 = vsub.f32 %v104_v14, %v134_v40 }
 0x224   :  { %142 = vadd.xlane.f32.xlu0 %v141_v42  ;;  %v195_v51 = vpop.eup %194 }
 0x225   :  { %v140_v44 = vmul.f32 %v138_v43, %v136_v32 }
 0x227   :  { %v144_v45 = vsel %vm96_vm0, %v140_v44, 0.0 }
 0x228   :  { %145 = vadd.xlane.f32.xlu1 %v144_v45 }
 0x2b1   :  { %v143_v49 = vpop.xlane.xlu0 %142 }
 0x2b2   :  { %v154_v50 = vmul.f32 %v193_v48, %v143_v49 }
 0x2b4   :  { %v157_v52 = vmul.f32 -1.0, %v154_v50 }
 0x2b5   :  { %v146_v53 = vpop.xlane.xlu1 %145 }
 0x2b6   :  { %160 = vst.msk [vmem:[%s240_s2] sm:$0xff] %vm159_vm3, %v157_v52  ;;  %v156_v54 = vmul.f32 %v195_v51, %v146_v53 }
 0x2b8   :  { %v158_v55 = vmul.f32 -1.0, %v156_v54 }
 0x2ba   :  { %161 = vst.msk [vmem:[%s240_s2 + $0x8] sm:$0xff] %vm159_vm3, %v158_v55 }

</bundles_post_ra>
